<compile_context>
chip_gen: v7x
topology: tpu7x:2x2x1
jax: 0.10.0
libtpu: 0.0.40
codegen_flags: <defaults>
</compile_context>

<pallas_src>
import numpy as np
import jax
import jax.numpy as jnp
from jax.experimental import pallas as pl
from jax.experimental.pallas import tpu as pltpu

U0 = 10.0                    # m^2 / s^2
R = 0.1                      # m
NEG_INV_R = -1.0 / R         # folded constant (no divide in-kernel)
PAD_SENTINEL = 1.0e9         # padded boundary coord; 2*(1e9)^2 stays finite in f32
MAX_LIVE_BYTES = 128 * 1024  # cap tile_n * mchunk * 4B live d2 tile (avoid vreg spills)


def make_pedspace_kernel(nb, m_pad, mchunk):
    def pedspace_kernel(p_ref, bx_ref, by_ref, out_ref):
        px = p_ref[:, 0:1]            # (TN, 1) pedestrians on the sublane axis
        py = p_ref[:, 1:2]            # (TN, 1)
        dmins = []
        for b in range(nb):                           # NB is small -> static unroll
            dmin2 = None
            for c0 in range(0, m_pad, mchunk):        # chunk the lane axis, running min
                c = min(mchunk, m_pad - c0)
                bxc = bx_ref[b:b + 1, c0:c0 + c]      # (1, c) boundary points on lanes
                byc = by_ref[b:b + 1, c0:c0 + c]
                dx = px - bxc                         # (TN, c) broadcast
                dy = py - byc
                d2 = dx * dx + dy * dy                # squared distance; NO sqrt here
                cmin = jnp.min(d2, axis=1, keepdims=True)        # (TN, 1)
                dmin2 = cmin if dmin2 is None else jnp.minimum(dmin2, cmin)
            dmins.append(dmin2)
        dall = jnp.concatenate(dmins, axis=1) if nb > 1 else dmins[0]   # (TN, NB)
        # single sqrt + exp on the reduced (TN, NB) result, -1/r pre-folded
        out_ref[...] = U0 * jnp.exp(jnp.sqrt(dall) * NEG_INV_R)
    return pedspace_kernel


def ped_space_potential(state, space, tile_n=256):
    """state: (N, D) with positions in columns 0:2; space: list of (M_b, 2) arrays."""
    state = jnp.asarray(state, jnp.float32)
    N = state.shape[0]
    if len(space) == 0:
        # PyTorch path: norm of a (N, 0, 2) tensor -> (N, 0)
        return jnp.zeros((N, 0), jnp.float32)

    NB = len(space)
    max_m = max(int(np.asarray(b).shape[0]) for b in space)
    m_pad = max(128, ((max_m + 127) // 128) * 128)

    # Boundary coords, lane-dense (NB, m_pad); padded points get a huge sentinel
    # coordinate so their squared distance is enormous (no mask buffer needed).
    # NOTE: a boundary with zero valid points would yield value ~0.0 silently.
    bx = np.full((NB, m_pad), PAD_SENTINEL, np.float32)
    by = np.full((NB, m_pad), PAD_SENTINEL, np.float32)
    for i, b in enumerate(space):
        b = np.asarray(b, np.float32)
        m = b.shape[0]
        bx[i, :m] = b[:, 0]
        by[i, :m] = b[:, 1]
    bx = jnp.asarray(bx)
    by = jnp.asarray(by)

    # Pedestrian tiling (sublane axis): multiple of 8, don't overshoot tiny N.
    n_pad8 = ((N + 7) // 8) * 8
    tile_n = max(8, (min(tile_n, n_pad8) // 8) * 8)
    n_pad = ((N + tile_n - 1) // tile_n) * tile_n

    p = state[:, 0:2]
    if n_pad != N:
        p = jnp.pad(p, ((0, n_pad - N), (0, 0)))   # fake peds at origin, sliced off later

    # Lane-chunk size so the live (tile_n, mchunk) f32 tile stays within budget.
    mchunk = max(128, (MAX_LIVE_BYTES // (tile_n * 4)) // 128 * 128)
    mchunk = min(mchunk, m_pad)

    kernel = make_pedspace_kernel(NB, m_pad, mchunk)

    out = pl.pallas_call(
        kernel,
        out_shape=jax.ShapeDtypeStruct((n_pad, NB), jnp.float32),
        grid_spec=pltpu.PrefetchScalarGridSpec(
            num_scalar_prefetch=0,
            grid=(n_pad // tile_n,),
            in_specs=[
                pl.BlockSpec((tile_n, 2), lambda i: (i, 0)),    # positions (x, y)
                pl.BlockSpec((NB, m_pad), lambda i: (0, 0)),    # boundary x (resident)
                pl.BlockSpec((NB, m_pad), lambda i: (0, 0)),    # boundary y (resident)
            ],
            out_specs=pl.BlockSpec((tile_n, NB), lambda i: (i, 0)),
        ),
        compiler_params=pltpu.CompilerParams(
            dimension_semantics=("parallel",)),
    )(p, bx, by)
    return out[:N]


if __name__ == "__main__":
    key = jax.random.PRNGKey(0)
    k_state, k_b0, k_b1, k_b2 = jax.random.split(key, 4)

    N = 8
    # social-force-style state: [x, y, vx, vy, gx, gy]
    state = jax.random.normal(k_state, (N, 6), jnp.float32) * 2.0
    # three boundaries (point sets) of different lengths
    space = [
        jax.random.normal(k_b0, (17, 2), jnp.float32) * 3.0,
        jax.random.normal(k_b1, (33, 2), jnp.float32) * 3.0,
        jax.random.normal(k_b2, (9, 2), jnp.float32) * 3.0,
    ]

    out = ped_space_potential(state, space)
    out = jax.block_until_ready(out)

    # pure-numpy reference mirroring the PyTorch forward
    st = np.asarray(state)
    r_a = st[:, 0:2][:, None, :]                       # (N, 1, 2)
    closest = []
    for B in space:
        Bn = np.asarray(B, np.float32)
        d = np.linalg.norm(r_a - Bn[None, :, :], axis=-1)   # (N, M_b)
        idx = np.argmin(d, axis=1)
        closest.append(Bn[idx])
    closest = np.stack(closest, axis=1)                # (N, NB, 2)
    r_aB = r_a - closest
    ref = U0 * np.exp(-np.linalg.norm(r_aB, axis=-1) / R)

    np.testing.assert_allclose(np.asarray(out), ref, rtol=1e-5, atol=1e-6)
    print("KERNEL_OK")
</pallas_src>

<mosaic_0001>
module attributes {stable_mosaic.version = 11 : i64} {
  func.func @pedspace_kernel(%arg0: i32, %arg1: memref<8x2xf32, #tpu.memory_space<vmem>>, %arg2: memref<3x128xf32, #tpu.memory_space<vmem>>, %arg3: memref<3x128xf32, #tpu.memory_space<vmem>>, %arg4: memref<8x3xf32, #tpu.memory_space<vmem>>) attributes {dimension_semantics = [#tpu.dimension_semantics<parallel>], iteration_bounds = array<i64: 1>, scalar_prefetch = 0 : i64, scratch_operands = 0 : i64, tpu.core_type = #tpu.core_type<tc>, window_params = [{transform_indices = @transform_0, window_bounds = array<i64: 8, 2>}, {pipeline_mode = #tpu.pipeline_mode<synchronous>, transform_indices = @transform_1, window_bounds = array<i64: 3, 128>}, {pipeline_mode = #tpu.pipeline_mode<synchronous>, transform_indices = @transform_2, window_bounds = array<i64: 3, 128>}, {transform_indices = @transform_3, window_bounds = array<i64: 8, 3>}]} {
    %c0 = arith.constant 0 : index
    %c0_0 = arith.constant 0 : index
    %0 = vector.load %arg1[%c0, %c0_0] : memref<8x2xf32, #tpu.memory_space<vmem>>, vector<8x1xf32>
    %c0_1 = arith.constant 0 : index
    %c1 = arith.constant 1 : index
    %1 = vector.load %arg1[%c0_1, %c1] : memref<8x2xf32, #tpu.memory_space<vmem>>, vector<8x1xf32>
    %c0_2 = arith.constant 0 : index
    %c0_3 = arith.constant 0 : index
    %2 = vector.load %arg2[%c0_2, %c0_3] : memref<3x128xf32, #tpu.memory_space<vmem>>, vector<1x128xf32>
    %c0_4 = arith.constant 0 : index
    %c0_5 = arith.constant 0 : index
    %3 = vector.load %arg3[%c0_4, %c0_5] : memref<3x128xf32, #tpu.memory_space<vmem>>, vector<1x128xf32>
    %4 = vector.broadcast %0 : vector<8x1xf32> to vector<8x128xf32>
    %5 = vector.broadcast %2 : vector<1x128xf32> to vector<8x128xf32>
    %6 = arith.subf %4, %5 : vector<8x128xf32>
    %7 = vector.broadcast %1 : vector<8x1xf32> to vector<8x128xf32>
    %8 = vector.broadcast %3 : vector<1x128xf32> to vector<8x128xf32>
    %9 = arith.subf %7, %8 : vector<8x128xf32>
    %10 = arith.mulf %6, %6 : vector<8x128xf32>
    %11 = arith.mulf %9, %9 : vector<8x128xf32>
    %12 = arith.addf %10, %11 : vector<8x128xf32>
    %cst = arith.constant dense<0x7F800000> : vector<8xf32>
    %13 = vector.multi_reduction <minimumf>, %12, %cst [1] : vector<8x128xf32> to vector<8xf32>
    %14 = vector.shape_cast %13 : vector<8xf32> to vector<8x1xf32>
    %c1_6 = arith.constant 1 : index
    %c0_7 = arith.constant 0 : index
    %15 = vector.load %arg2[%c1_6, %c0_7] : memref<3x128xf32, #tpu.memory_space<vmem>>, vector<1x128xf32>
    %c1_8 = arith.constant 1 : index
    %c0_9 = arith.constant 0 : index
    %16 = vector.load %arg3[%c1_8, %c0_9] : memref<3x128xf32, #tpu.memory_space<vmem>>, vector<1x128xf32>
    %17 = vector.broadcast %0 : vector<8x1xf32> to vector<8x128xf32>
    %18 = vector.broadcast %15 : vector<1x128xf32> to vector<8x128xf32>
    %19 = arith.subf %17, %18 : vector<8x128xf32>
    %20 = vector.broadcast %1 : vector<8x1xf32> to vector<8x128xf32>
    %21 = vector.broadcast %16 : vector<1x128xf32> to vector<8x128xf32>
    %22 = arith.subf %20, %21 : vector<8x128xf32>
    %23 = arith.mulf %19, %19 : vector<8x128xf32>
    %24 = arith.mulf %22, %22 : vector<8x128xf32>
    %25 = arith.addf %23, %24 : vector<8x128xf32>
    %cst_10 = arith.constant dense<0x7F800000> : vector<8xf32>
    %26 = vector.multi_reduction <minimumf>, %25, %cst_10 [1] : vector<8x128xf32> to vector<8xf32>
    %27 = vector.shape_cast %26 : vector<8xf32> to vector<8x1xf32>
    %c2 = arith.constant 2 : index
    %c0_11 = arith.constant 0 : index
    %28 = vector.load %arg2[%c2, %c0_11] : memref<3x128xf32, #tpu.memory_space<vmem>>, vector<1x128xf32>
    %c2_12 = arith.constant 2 : index
    %c0_13 = arith.constant 0 : index
    %29 = vector.load %arg3[%c2_12, %c0_13] : memref<3x128xf32, #tpu.memory_space<vmem>>, vector<1x128xf32>
    %30 = vector.broadcast %0 : vector<8x1xf32> to vector<8x128xf32>
    %31 = vector.broadcast %28 : vector<1x128xf32> to vector<8x128xf32>
    %32 = arith.subf %30, %31 : vector<8x128xf32>
    %33 = vector.broadcast %1 : vector<8x1xf32> to vector<8x128xf32>
    %34 = vector.broadcast %29 : vector<1x128xf32> to vector<8x128xf32>
    %35 = arith.subf %33, %34 : vector<8x128xf32>
    %36 = arith.mulf %32, %32 : vector<8x128xf32>
    %37 = arith.mulf %35, %35 : vector<8x128xf32>
    %38 = arith.addf %36, %37 : vector<8x128xf32>
    %cst_14 = arith.constant dense<0x7F800000> : vector<8xf32>
    %39 = vector.multi_reduction <minimumf>, %38, %cst_14 [1] : vector<8x128xf32> to vector<8xf32>
    %40 = vector.shape_cast %39 : vector<8xf32> to vector<8x1xf32>
    %41 = tpu.concatenate %14, %27, %40 in 1 : vector<8x1xf32>, vector<8x1xf32>, vector<8x1xf32> -> vector<8x3xf32>
    %42 = math.sqrt %41 : vector<8x3xf32>
    %cst_15 = arith.constant -1.000000e+01 : f32
    %43 = vector.broadcast %cst_15 : f32 to vector<8x3xf32>
    %44 = arith.mulf %42, %43 : vector<8x3xf32>
    %45 = math.exp %44 : vector<8x3xf32>
    %cst_16 = arith.constant 1.000000e+01 : f32
    %46 = vector.broadcast %cst_16 : f32 to vector<8x3xf32>
    %47 = arith.mulf %46, %45 : vector<8x3xf32>
    %c0_17 = arith.constant 0 : index
    %c0_18 = arith.constant 0 : index
    %48 = vector.load %arg4[%c0_17, %c0_18] : memref<8x3xf32, #tpu.memory_space<vmem>>, vector<8x3xf32>
    tpu.vector_store %arg4[%c0_17, %c0_18], %47 {strides = array<i32>} : memref<8x3xf32, #tpu.memory_space<vmem>>, vector<8x3xf32>,
    return
  }
  func.func @transform_0(%arg0: i32) -> (i32, i32) {
    %c0_i32 = arith.constant 0 : i32
    %c0_i32_0 = arith.constant 0 : i32
    return %arg0, %c0_i32 : i32, i32
  }
  func.func @transform_1(%arg0: i32) -> (i32, i32) {
    %c0_i32 = arith.constant 0 : i32
    %c0_i32_0 = arith.constant 0 : i32
    %c0_i32_1 = arith.constant 0 : i32
    return %c0_i32, %c0_i32_0 : i32, i32
  }
  func.func @transform_2(%arg0: i32) -> (i32, i32) {
    %c0_i32 = arith.constant 0 : i32
    %c0_i32_0 = arith.constant 0 : i32
    %c0_i32_1 = arith.constant 0 : i32
    return %c0_i32, %c0_i32_0 : i32, i32
  }
  func.func @transform_3(%arg0: i32) -> (i32, i32) {
    %c0_i32 = arith.constant 0 : i32
    %c0_i32_0 = arith.constant 0 : i32
    return %arg0, %c0_i32 : i32, i32
  }
}

</mosaic_0001>

<bundles_post_ra>
// kernel: tpu_custom_call.1
= control target key start
LH: loop header
LB: loop body
LE: loop exit
PB: predicated region body
PF: predicated region fallthrough
CT: control target
= control target key end

     0   :  { %v110_v0 = vmov 0   ;;  %v111_v2 = vmov 1   ;;  %vm75_vm0 = vcmask 7168   ;;  %vm77_vm1 = vcmask 15360   ;;  %s156_s0 = inlined_call_operand.vmem [shape: f32[8,2], index: 0, kind: input, shape index: {}]   ;;  %s157_s1 = inlined_call_operand.vmem [shape: f32[3,128], index: 1, kind: input, shape index: {}]   ;;  %s158_s2 = inlined_call_operand.vmem [shape: f32[3,128], index: 2, kind: input, shape index: {}]   ;;  %s159_s3 = inlined_call_operand.vmem [shape: f32[8,3], index: 3, kind: output, shape index: {}]  }
   0x1   :  { %104 = vset.pattern.permute.xlu0 %v110_v0  ;;  %v14_v1 = vld [vmem:[%s156_s0] sm:$0xff]  ;;  %vm90_vm4 = vcmask 23552  }
   0x2   :  { %19 = vperm.xlu0 %104, %v14_v1   ;;  %v96_v4 = vld [vmem:[%s157_s1] ss:$0 sm:$0xff]  ;;  %v99_v6 = vld [vmem:[%s158_s2 + $0x1] ss:$0 sm:$0xff]  ;;  %v101_v12 = vld [vmem:[%s158_s2 + $0x2] ss:$0 sm:$0xff] }
   0x3   :  { %v97_v5 = vld [vmem:[%s158_s2] ss:$0 sm:$0xff]  ;;  %v98_v8 = vld [vmem:[%s157_s1 + $0x1] ss:$0 sm:$0xff]  ;;  %v100_v16 = vld [vmem:[%s157_s1 + $0x2] ss:$0 sm:$0xff] }
   0x6   :  { %105 = vset.pattern.permute.xlu0 %v111_v2 }
   0x7   :  { %28 = vperm.xlu0 %105, %v14_v1  }
  0x81   :  { %v20_v3 = vpop.permute.xlu0 %19 }
  0x82   :  { %v26_v7 = vsub.f32 %v20_v3, %v96_v4  ;;  %v47_v13 = vsub.f32 %v20_v3, %v98_v8  ;;  %v64_v20 = vsub.f32 %v20_v3, %v100_v16 }
  0x84   :  { %v36_v14 = vmul.f32 %v26_v7, %v26_v7  ;;  %v53_v21 = vmul.f32 %v47_v13, %v47_v13  ;;  %v70_v24 = vmul.f32 %v64_v20, %v64_v20 }
  0x86   :  { %v29_v9 = vpop.permute.xlu0 %28 }
  0x87   :  { %v35_v10 = vsub.f32 %v29_v9, %v97_v5  ;;  %v52_v11 = vsub.f32 %v29_v9, %v99_v6  ;;  %v69_v18 = vsub.f32 %v29_v9, %v101_v12 }
  0x89   :  { %v37_v15 = vmul.f32 %v35_v10, %v35_v10  ;;  %v54_v17 = vmul.f32 %v52_v11, %v52_v11  ;;  %v71_v22 = vmul.f32 %v69_v18, %v69_v18 }
  0x8b   :  { %v38_v19 = vadd.f32 %v37_v15, %v36_v14  ;;  %v55_v23 = vadd.f32 %v54_v17, %v53_v21  ;;  %v72_v25 = vadd.f32 %v71_v22, %v70_v24 }
  0x8d   :  { %39 = vmin.xlane.f32.xlu1 %v38_v19 }
  0x91   :  { %56 = vmin.xlane.f32.xlu1 %v55_v23 }
  0x95   :  { %73 = vmin.xlane.f32.xlu1 %v72_v25 }
 0x11a   :  { %v40_v26 = vpop.xlane.xlu1 %39 }
 0x11e   :  { %v57_v27 = vpop.xlane.xlu1 %56 }
 0x11f   :  { %v76_v28 = vsel %vm75_vm0, %v40_v26, %v57_v27 }
 0x122   :  { %v74_v29 = vpop.xlane.xlu1 %73 }
 0x123   :  { %v78_v30 = vsel %vm77_vm1, %v76_v28, %v74_v29 }
 0x124   :  { %106 = vrsqrt.f32 %v78_v30  ;;  %vm81_vm2 = vcmp.eq.f32.partialorder %v78_v30, inf  ;;  %v84_v33 = vand.u32 2147483648, %v78_v30  ;;  %vm83_vm3 = vcmp.eq.f32.partialorder %v78_v30, 0.0 }
 0x12e   :  { %v107_v31 = vpop.eup %106 }
 0x12f   :  { %v80_v32 = vmul.f32 %v107_v31, %v78_v30 }
 0x131   :  { %v82_v34 = vsel %vm81_vm2, %v78_v30, %v80_v32 }
 0x132   :  { %v85_v35 = vsel %vm83_vm3, %v84_v33, %v82_v34 }
 0x133   :  { %v86_v36 = vmul.f32 -10.0, %v85_v35 }
 0x135   :  { %v87_v37 = vmul.f32 1.442695, %v86_v36 }
 0x137   :  { %108 = vpow2.f32 %v87_v37 }
 0x141   :  { %v109_v38 = vpop.eup %108 }
 0x142   :  { %v89_v39 = vmul.f32 10.0, %v109_v38 }
 0x144   :  { %91 = vst.msk [vmem:[%s159_s3] sm:$0xff] %vm90_vm4, %v89_v39 }

</bundles_post_ra>
